<compile_context>
chip_gen: v6e
topology: v6e:2x2x1
jax: 0.10.0
libtpu: 0.0.40
codegen_flags: <defaults>
</compile_context>

<pallas_src>
import functools
import math

import jax
import jax.numpy as jnp
from jax.experimental import pallas as pl
from jax.experimental.pallas import tpu as pltpu

EPS = 1e-5  # nn.LayerNorm default used by the builder


# ----------------------------- in-kernel helpers -----------------------------

def _layernorm(x, w, b):
    mu = jnp.mean(x, axis=-1, keepdims=True)
    xc = x - mu
    var = jnp.mean(xc * xc, axis=-1, keepdims=True)
    return xc * jax.lax.rsqrt(var + EPS) * w + b


def _quick_gelu(x):
    # GELU_QUICK used by the CLIP config: x * sigmoid(1.702 * x)
    return x * jax.nn.sigmoid(1.702 * x)


# ----------------------------- transformer block ------------------------------

def clip_layer_kernel(x_ref,
                      ln1_w, ln1_b, wqkv, bqkv, wo, bo,
                      ln2_w, ln2_b, w1, b1, w2, b2,
                      fin_w, fin_b,
                      o_ref,
                      *, bblk, seq_len, num_heads, apply_final_norm):
    T = seq_len
    H = num_heads
    D = wo.shape[0]
    hd = D // H
    BT = bblk * T

    if bblk == 1:
        x = x_ref[0]                       # (T, D) f32 residual stream
    else:
        # Only taken when T % 8 == 0 (layout-free sublane merge, see _pick_block_batch)
        x = x_ref[...].reshape(BT, D)      # (bblk*T, D) -> bigger MXU M dimension

    # Causal additive mask built on the VPU — no (T, T) HBM input.
    row = jax.lax.broadcasted_iota(jnp.int32, (T, T), 0)
    col = jax.lax.broadcasted_iota(jnp.int32, (T, T), 1)
    mask = jnp.where(row >= col, jnp.float32(0.0), jnp.float32(-jnp.inf))

    # --- self attention (pre-norm), fused QKV projection -------------------------
    # The 1/sqrt(hd) scale is already folded into the Q columns of wqkv / bqkv.
    h = _layernorm(x, ln1_w[...], ln1_b[...]).astype(jnp.bfloat16)
    qkv = jnp.dot(h, wqkv[...], preferred_element_type=jnp.float32) + bqkv[...]
    qkv = qkv.astype(jnp.bfloat16)         # cast ONCE, hoisted out of head handling
    q, k, v = qkv[:, :D], qkv[:, D:2 * D], qkv[:, 2 * D:]

    outs = []
    for b in range(bblk):                  # bblk is 1 or 2 (small, static)
        r0 = b * T
        # (H, T, hd) head-major stacks; attention runs as ONE batched einsum pair.
        qh = jnp.stack([q[r0:r0 + T, hh * hd:(hh + 1) * hd] for hh in range(H)], axis=0)
        kh = jnp.stack([k[r0:r0 + T, hh * hd:(hh + 1) * hd] for hh in range(H)], axis=0)
        vh = jnp.stack([v[r0:r0 + T, hh * hd:(hh + 1) * hd] for hh in range(H)], axis=0)

        s = jnp.einsum('hqd,hkd->hqk', qh, kh, preferred_element_type=jnp.float32)
        s = s + mask[None, :, :]
        m = jnp.max(s, axis=-1, keepdims=True)
        p = jnp.exp(s - m)                                # unnormalized numerator
        den = jnp.sum(p, axis=-1, keepdims=True)
        o = jnp.einsum('hqk,hkd->hqd', p.astype(jnp.bfloat16), vh,
                       preferred_element_type=jnp.float32)
        # deferred normalization via EUP approx reciprocal (inference tolerance)
        o = o * pl.reciprocal(den, approx=True)
        # concatenate heads in registers -> lane-dense (T, D), no scratch round trip
        outs.append(jnp.concatenate([o[hh] for hh in range(H)], axis=-1))
    attn = outs[0] if bblk == 1 else jnp.concatenate(outs, axis=0)   # (BT, D)

    proj = jnp.dot(attn.astype(jnp.bfloat16), wo[...],
                   preferred_element_type=jnp.float32) + bo[...]
    x = x + proj

    # --- feed forward (pre-norm) --------------------------------------------------
    h2 = _layernorm(x, ln2_w[...], ln2_b[...]).astype(jnp.bfloat16)
    f = jnp.dot(h2, w1[...], preferred_element_type=jnp.float32) + b1[...]
    f = _quick_gelu(f)
    f = jnp.dot(f.astype(jnp.bfloat16), w2[...], preferred_element_type=jnp.float32) + b2[...]
    y = x + f

    if apply_final_norm:                   # static (Python) flag — fused final LN
        y = _layernorm(y, fin_w[...], fin_b[...])

    if bblk == 1:
        o_ref[0] = y
    else:
        o_ref[...] = y.reshape(bblk, T, D)


# ----------------------------- wrapper helpers --------------------------------

@functools.cache
def _single_buffered_weights_supported():
    """AOT-compile a tiny probe once; robust even when the caller is jitted."""
    def _probe(a_ref, o_ref):
        o_ref[...] = a_ref[...] + 1.0
    try:
        f = pl.pallas_call(
            _probe,
            out_shape=jax.ShapeDtypeStruct((8, 128), jnp.float32),
            grid=(2,),
            in_specs=[pl.BlockSpec((8, 128), lambda i: (0, 0),
                                   pipeline_mode=pl.Buffered(1))],
            out_specs=pl.BlockSpec((8, 128), lambda i: (0, 0)),
        )
        jax.jit(f).lower(jax.ShapeDtypeStruct((8, 128), jnp.float32)).compile()
        return True
    except Exception:
        return False


def _physical_vmem_bytes():
    try:
        return int(pltpu.get_tpu_info().vmem_capacity_bytes)
    except Exception:
        return 64 << 20          # conservative: v7x has the smallest VMEM


def _vmem_limit_bytes(bblk, T, D, F, H, double_buffered_weights):
    wmul = 2 if double_buffered_weights else 1
    weight_bytes = wmul * 2 * (4 * D * D + 2 * D * F)          # bf16 weights
    act_bytes = 4 * (bblk * T * (10 * D + 3 * F) + 3 * bblk * H * T * T)
    need = int(1.4 * (weight_bytes + act_bytes)) + (4 << 20)
    cap = int(0.9 * _physical_vmem_bytes())                    # 64 MiB cap only on v7x
    return max(32 << 20, min(need, cap))


def _pick_block_batch(B, T):
    # Fold batch into the matmul M dimension only when the (bblk,T,D)->(bblk*T,D)
    # merge is layout-free (T multiple of the 8-row sublane tile) and we still keep
    # >= 2 grid steps so both v7x TensorCores have work.
    if T % 8 == 0 and B % 2 == 0 and B >= 4:
        return 2
    return 1


# ----------------------------- layer wrapper -----------------------------------

def clip_layer(x, p, num_heads, final_w=None, final_b=None, block_batch=None):
    B, T, D = x.shape
    F = p["w1"].shape[1]
    apply_final_norm = final_w is not None
    if final_w is None:
        final_w = jnp.ones((1, D), jnp.float32)
        final_b = jnp.zeros((1, D), jnp.float32)

    bblk = _pick_block_batch(B, T) if block_batch is None else block_batch
    assert B % bblk == 0
    grid = (B // bblk,)

    single_buf = _single_buffered_weights_supported()

    bf16 = functools.partial(jnp.asarray, dtype=jnp.bfloat16)   # no-op if already bf16
    operands = (
        x,
        p["ln1_w"], p["ln1_b"],
        bf16(p["wqkv"]), p["bqkv"],
        bf16(p["wo"]), p["bo"],
        p["ln2_w"], p["ln2_b"],
        bf16(p["w1"]), p["b1"],
        bf16(p["w2"]), p["b2"],
        final_w, final_b,
    )

    def const_spec(shape):
        nd = len(shape)
        kwargs = {}
        if single_buf:
            # index_map is constant across the batch grid -> double-buffering these
            # weights would be pure VMEM waste.
            kwargs["pipeline_mode"] = pl.Buffered(1)
        return pl.BlockSpec(shape, lambda i, _nd=nd: (0,) * _nd, **kwargs)

    in_specs = [pl.BlockSpec((bblk, T, D), lambda i: (i, 0, 0))]
    in_specs += [const_spec(op.shape) for op in operands[1:]]

    kernel = functools.partial(
        clip_layer_kernel, bblk=bblk, seq_len=T, num_heads=num_heads,
        apply_final_norm=apply_final_norm)

    return pl.pallas_call(
        kernel,
        out_shape=jax.ShapeDtypeStruct((B, T, D), jnp.float32),
        grid=grid,
        in_specs=in_specs,
        out_specs=pl.BlockSpec((bblk, T, D), lambda i: (i, 0, 0)),
        compiler_params=pltpu.CompilerParams(
            dimension_semantics=("parallel",),
            vmem_limit_bytes=_vmem_limit_bytes(
                bblk, T, D, F, num_heads, double_buffered_weights=not single_buf)),
    )(*operands)


# ----------------------------- full forward pass -------------------------------

def clip_forward(tokens, params, cfg):
    B, T = tokens.shape
    # glue: embedding gather + learned positional embedding (outside the Pallas hot path)
    state = jnp.take(params["tok_embedding"], tokens, axis=0) \
        + params["tok_embedding_position"][None, :T, :]
    n_layers = len(params["layers"])
    for i, layer_params in enumerate(params["layers"]):
        last = i == n_layers - 1
        state = clip_layer(
            state, layer_params, cfg["num_heads"],
            final_w=params["final_w"] if last else None,   # fused final LayerNorm
            final_b=params["final_b"] if last else None)
    return state


# ----------------------------- parameter init ----------------------------------

def init_params(key, cfg):
    V, D, T, F, L, H = (cfg["vocab_size"], cfg["embedding_dim"], cfg["max_seq_len"],
                        cfg["ff_dim"], cfg["num_layers"], cfg["num_heads"])
    hd = D // H
    scale = 1.0 / math.sqrt(hd)

    def nrm(k, shape, s=0.02):
        return s * jax.random.normal(k, shape, dtype=jnp.float32)

    keys = jax.random.split(key, 2 + L)
    params = {
        "tok_embedding": nrm(keys[0], (V, D)),
        "tok_embedding_position": nrm(keys[1], (T, D)),
        "final_w": jnp.ones((1, D), jnp.float32),
        "final_b": jnp.zeros((1, D), jnp.float32),
        "layers": [],
    }
    bf = jnp.bfloat16
    for l in range(L):
        lk = jax.random.split(keys[2 + l], 6)
        # One-time checkpoint-load-style conversion: concat Q/K/V and fold the
        # 1/sqrt(head_dim) attention scale into the Q columns / Q bias.
        wq, wk, wv = nrm(lk[0], (D, D)), nrm(lk[1], (D, D)), nrm(lk[2], (D, D))
        bq = jnp.zeros((D,), jnp.float32)
        bk = jnp.zeros((D,), jnp.float32)
        bv = jnp.zeros((D,), jnp.float32)
        wqkv = jnp.concatenate([wq * scale, wk, wv], axis=1).astype(bf)
        bqkv = jnp.concatenate([bq * scale, bk, bv])[None, :].astype(jnp.float32)
        params["layers"].append({
            "ln1_w": jnp.ones((1, D), jnp.float32),
            "ln1_b": jnp.zeros((1, D), jnp.float32),
            "wqkv": wqkv, "bqkv": bqkv,
            "wo": nrm(lk[3], (D, D)).astype(bf), "bo": jnp.zeros((1, D), jnp.float32),
            "ln2_w": jnp.ones((1, D), jnp.float32),
            "ln2_b": jnp.zeros((1, D), jnp.float32),
            "w1": nrm(lk[4], (D, F)).astype(bf), "b1": jnp.zeros((1, F), jnp.float32),
            "w2": nrm(lk[5], (F, D)).astype(bf), "b2": jnp.zeros((1, D), jnp.float32),
        })
    return params


if __name__ == "__main__":
    cfg = dict(vocab_size=128, embedding_dim=64, max_seq_len=16,
               num_heads=4, num_layers=2, ff_dim=128)
    B, T = 2, cfg["max_seq_len"]

    key = jax.random.PRNGKey(0)
    k_params, k_tok = jax.random.split(key)
    params = init_params(k_params, cfg)
    tokens = jax.random.randint(k_tok, (B, T), 0, cfg["vocab_size"], dtype=jnp.int32)

    out = clip_forward(tokens, params, cfg)
    out = jax.block_until_ready(out)
    assert out.shape == (B, T, cfg["embedding_dim"]) and out.dtype == jnp.float32
    print("KERNEL_OK")
</pallas_src>

<mosaic_0001>
module attributes {stable_mosaic.version = 11 : i64} {
  func.func @clip_layer_kernel(%arg0: i32, %arg1: memref<1x16x64xf32, #tpu.memory_space<vmem>>, %arg2: memref<1x64xf32, #tpu.memory_space<vmem>>, %arg3: memref<1x64xf32, #tpu.memory_space<vmem>>, %arg4: memref<64x192xbf16, #tpu.memory_space<vmem>>, %arg5: memref<1x192xf32, #tpu.memory_space<vmem>>, %arg6: memref<64x64xbf16, #tpu.memory_space<vmem>>, %arg7: memref<1x64xf32, #tpu.memory_space<vmem>>, %arg8: memref<1x64xf32, #tpu.memory_space<vmem>>, %arg9: memref<1x64xf32, #tpu.memory_space<vmem>>, %arg10: memref<64x128xbf16, #tpu.memory_space<vmem>>, %arg11: memref<1x128xf32, #tpu.memory_space<vmem>>, %arg12: memref<128x64xbf16, #tpu.memory_space<vmem>>, %arg13: memref<1x64xf32, #tpu.memory_space<vmem>>, %arg14: memref<1x64xf32, #tpu.memory_space<vmem>>, %arg15: memref<1x64xf32, #tpu.memory_space<vmem>>, %arg16: memref<1x16x64xf32, #tpu.memory_space<vmem>>) attributes {dimension_semantics = [#tpu.dimension_semantics<parallel>], iteration_bounds = array<i64: 2>, scalar_prefetch = 0 : i64, scratch_operands = 0 : i64, tpu.core_type = #tpu.core_type<tc>, window_params = [{transform_indices = @transform_0, window_bounds = array<i64: 1, 16, 64>}, {pipeline_mode = #tpu.pipeline_mode<synchronous>, transform_indices = @transform_1, window_bounds = array<i64: 1, 64>}, {pipeline_mode = #tpu.pipeline_mode<synchronous>, transform_indices = @transform_2, window_bounds = array<i64: 1, 64>}, {pipeline_mode = #tpu.pipeline_mode<synchronous>, transform_indices = @transform_3, window_bounds = array<i64: 64, 192>}, {pipeline_mode = #tpu.pipeline_mode<synchronous>, transform_indices = @transform_4, window_bounds = array<i64: 1, 192>}, {pipeline_mode = #tpu.pipeline_mode<synchronous>, transform_indices = @transform_5, window_bounds = array<i64: 64, 64>}, {pipeline_mode = #tpu.pipeline_mode<synchronous>, transform_indices = @transform_6, window_bounds = array<i64: 1, 64>}, {pipeline_mode = #tpu.pipeline_mode<synchronous>, transform_indices = @transform_7, window_bounds = array<i64: 1, 64>}, {pipeline_mode = #tpu.pipeline_mode<synchronous>, transform_indices = @transform_8, window_bounds = array<i64: 1, 64>}, {pipeline_mode = #tpu.pipeline_mode<synchronous>, transform_indices = @transform_9, window_bounds = array<i64: 64, 128>}, {pipeline_mode = #tpu.pipeline_mode<synchronous>, transform_indices = @transform_10, window_bounds = array<i64: 1, 128>}, {pipeline_mode = #tpu.pipeline_mode<synchronous>, transform_indices = @transform_11, window_bounds = array<i64: 128, 64>}, {pipeline_mode = #tpu.pipeline_mode<synchronous>, transform_indices = @transform_12, window_bounds = array<i64: 1, 64>}, {pipeline_mode = #tpu.pipeline_mode<synchronous>, transform_indices = @transform_13, window_bounds = array<i64: 1, 64>}, {pipeline_mode = #tpu.pipeline_mode<synchronous>, transform_indices = @transform_14, window_bounds = array<i64: 1, 64>}, {transform_indices = @transform_15, window_bounds = array<i64: 1, 16, 64>}]} {
    %c0 = arith.constant 0 : index
    %c0_0 = arith.constant 0 : index
    %c0_1 = arith.constant 0 : index
    %0 = vector.load %arg1[%c0, %c0_0, %c0_1] : memref<1x16x64xf32, #tpu.memory_space<vmem>>, vector<1x16x64xf32>
    %1 = vector.shape_cast %0 : vector<1x16x64xf32> to vector<16x64xf32>
    %2 = tpu.iota {dimensions = array<i32: 0>} : vector<16x16xi32>
    %3 = tpu.iota {dimensions = array<i32: 1>} : vector<16x16xi32>
    %4 = arith.cmpi sge, %2, %3 : vector<16x16xi32>
    %cst = arith.constant 0.000000e+00 : f32
    %cst_2 = arith.constant 0xFF800000 : f32
    %5 = vector.broadcast %cst : f32 to vector<16x16xf32>
    %6 = vector.broadcast %cst_2 : f32 to vector<16x16xf32>
    %7 = arith.select %4, %5, %6 : vector<16x16xi1>, vector<16x16xf32>
    %c0_3 = arith.constant 0 : index
    %c0_4 = arith.constant 0 : index
    %8 = vector.load %arg2[%c0_3, %c0_4] : memref<1x64xf32, #tpu.memory_space<vmem>>, vector<1x64xf32>
    %c0_5 = arith.constant 0 : index
    %c0_6 = arith.constant 0 : index
    %9 = vector.load %arg3[%c0_5, %c0_6] : memref<1x64xf32, #tpu.memory_space<vmem>>, vector<1x64xf32>
    %cst_7 = arith.constant dense<0.000000e+00> : vector<16xf32>
    %10 = vector.multi_reduction <add>, %1, %cst_7 [1] : vector<16x64xf32> to vector<16xf32>
    %11 = vector.shape_cast %10 : vector<16xf32> to vector<16x1xf32>
    %cst_8 = arith.constant 6.400000e+01 : f32
    %12 = vector.broadcast %cst_8 : f32 to vector<16x1xf32>
    %13 = arith.divf %11, %12 : vector<16x1xf32>
    %14 = vector.broadcast %13 : vector<16x1xf32> to vector<16x64xf32>
    %15 = arith.subf %1, %14 : vector<16x64xf32>
    %16 = arith.mulf %15, %15 : vector<16x64xf32>
    %cst_9 = arith.constant dense<0.000000e+00> : vector<16xf32>
    %17 = vector.multi_reduction <add>, %16, %cst_9 [1] : vector<16x64xf32> to vector<16xf32>
    %18 = vector.shape_cast %17 : vector<16xf32> to vector<16x1xf32>
    %cst_10 = arith.constant 6.400000e+01 : f32
    %19 = vector.broadcast %cst_10 : f32 to vector<16x1xf32>
    %20 = arith.divf %18, %19 : vector<16x1xf32>
    %cst_11 = arith.constant 9.99999974E-6 : f32
    %21 = vector.broadcast %cst_11 : f32 to vector<16x1xf32>
    %22 = arith.addf %20, %21 : vector<16x1xf32>
    %23 = math.rsqrt %22 : vector<16x1xf32>
    %24 = vector.broadcast %23 : vector<16x1xf32> to vector<16x64xf32>
    %25 = arith.mulf %15, %24 : vector<16x64xf32>
    %26 = vector.broadcast %8 : vector<1x64xf32> to vector<16x64xf32>
    %27 = arith.mulf %25, %26 : vector<16x64xf32>
    %28 = vector.broadcast %9 : vector<1x64xf32> to vector<16x64xf32>
    %29 = arith.addf %27, %28 : vector<16x64xf32>
    %30 = arith.truncf %29 : vector<16x64xf32> to vector<16x64xbf16>
    %c0_12 = arith.constant 0 : index
    %c0_13 = arith.constant 0 : index
    %31 = vector.load %arg4[%c0_12, %c0_13] : memref<64x192xbf16, #tpu.memory_space<vmem>>, vector<64x192xbf16>
    %cst_14 = arith.constant dense<0.000000e+00> : vector<16x192xf32>
    %32 = tpu.matmul %30, %31, %cst_14 {dimension_numbers = #tpu.dot_dimension_numbers<[1], [0], [0], [1], [0, 0, 1, 1], [], []>} : vector<16x64xbf16>, vector<64x192xbf16>, vector<16x192xf32> -> vector<16x192xf32>
    %c0_15 = arith.constant 0 : index
    %c0_16 = arith.constant 0 : index
    %33 = vector.load %arg5[%c0_15, %c0_16] : memref<1x192xf32, #tpu.memory_space<vmem>>, vector<1x192xf32>
    %34 = vector.broadcast %33 : vector<1x192xf32> to vector<16x192xf32>
    %35 = arith.addf %32, %34 : vector<16x192xf32>
    %36 = arith.truncf %35 : vector<16x192xf32> to vector<16x192xbf16>
    %37 = vector.extract_strided_slice %36 {offsets = [0, 0], sizes = [16, 64], strides = [1, 1]} : vector<16x192xbf16> to vector<16x64xbf16>
    %38 = vector.extract_strided_slice %36 {offsets = [0, 64], sizes = [16, 64], strides = [1, 1]} : vector<16x192xbf16> to vector<16x64xbf16>
    %39 = vector.extract_strided_slice %36 {offsets = [0, 128], sizes = [16, 64], strides = [1, 1]} : vector<16x192xbf16> to vector<16x64xbf16>
    %40 = vector.extract_strided_slice %37 {offsets = [0, 0], sizes = [16, 16], strides = [1, 1]} : vector<16x64xbf16> to vector<16x16xbf16>
    %41 = vector.extract_strided_slice %37 {offsets = [0, 16], sizes = [16, 16], strides = [1, 1]} : vector<16x64xbf16> to vector<16x16xbf16>
    %42 = vector.extract_strided_slice %37 {offsets = [0, 32], sizes = [16, 16], strides = [1, 1]} : vector<16x64xbf16> to vector<16x16xbf16>
    %43 = vector.extract_strided_slice %37 {offsets = [0, 48], sizes = [16, 16], strides = [1, 1]} : vector<16x64xbf16> to vector<16x16xbf16>
    %44 = vector.shape_cast %40 : vector<16x16xbf16> to vector<1x16x16xbf16>
    %45 = vector.shape_cast %41 : vector<16x16xbf16> to vector<1x16x16xbf16>
    %46 = vector.shape_cast %42 : vector<16x16xbf16> to vector<1x16x16xbf16>
    %47 = vector.shape_cast %43 : vector<16x16xbf16> to vector<1x16x16xbf16>
    %48 = tpu.concatenate %44, %45, %46, %47 in 0 : vector<1x16x16xbf16>, vector<1x16x16xbf16>, vector<1x16x16xbf16>, vector<1x16x16xbf16> -> vector<4x16x16xbf16>
    %49 = vector.extract_strided_slice %38 {offsets = [0, 0], sizes = [16, 16], strides = [1, 1]} : vector<16x64xbf16> to vector<16x16xbf16>
    %50 = vector.extract_strided_slice %38 {offsets = [0, 16], sizes = [16, 16], strides = [1, 1]} : vector<16x64xbf16> to vector<16x16xbf16>
    %51 = vector.extract_strided_slice %38 {offsets = [0, 32], sizes = [16, 16], strides = [1, 1]} : vector<16x64xbf16> to vector<16x16xbf16>
    %52 = vector.extract_strided_slice %38 {offsets = [0, 48], sizes = [16, 16], strides = [1, 1]} : vector<16x64xbf16> to vector<16x16xbf16>
    %53 = vector.shape_cast %49 : vector<16x16xbf16> to vector<1x16x16xbf16>
    %54 = vector.shape_cast %50 : vector<16x16xbf16> to vector<1x16x16xbf16>
    %55 = vector.shape_cast %51 : vector<16x16xbf16> to vector<1x16x16xbf16>
    %56 = vector.shape_cast %52 : vector<16x16xbf16> to vector<1x16x16xbf16>
    %57 = tpu.concatenate %53, %54, %55, %56 in 0 : vector<1x16x16xbf16>, vector<1x16x16xbf16>, vector<1x16x16xbf16>, vector<1x16x16xbf16> -> vector<4x16x16xbf16>
    %58 = vector.extract_strided_slice %39 {offsets = [0, 0], sizes = [16, 16], strides = [1, 1]} : vector<16x64xbf16> to vector<16x16xbf16>
    %59 = vector.extract_strided_slice %39 {offsets = [0, 16], sizes = [16, 16], strides = [1, 1]} : vector<16x64xbf16> to vector<16x16xbf16>
    %60 = vector.extract_strided_slice %39 {offsets = [0, 32], sizes = [16, 16], strides = [1, 1]} : vector<16x64xbf16> to vector<16x16xbf16>
    %61 = vector.extract_strided_slice %39 {offsets = [0, 48], sizes = [16, 16], strides = [1, 1]} : vector<16x64xbf16> to vector<16x16xbf16>
    %62 = vector.shape_cast %58 : vector<16x16xbf16> to vector<1x16x16xbf16>
    %63 = vector.shape_cast %59 : vector<16x16xbf16> to vector<1x16x16xbf16>
    %64 = vector.shape_cast %60 : vector<16x16xbf16> to vector<1x16x16xbf16>
    %65 = vector.shape_cast %61 : vector<16x16xbf16> to vector<1x16x16xbf16>
    %66 = tpu.concatenate %62, %63, %64, %65 in 0 : vector<1x16x16xbf16>, vector<1x16x16xbf16>, vector<1x16x16xbf16>, vector<1x16x16xbf16> -> vector<4x16x16xbf16>
    "tpu.trace_start"() <{level = 10 : i32, message = "hqd,hkd->hqk"}> : () -> ()
    %cst_17 = arith.constant dense<0.000000e+00> : vector<4x16x16xf32>
    %67 = tpu.matmul %48, %57, %cst_17 {dimension_numbers = #tpu.dot_dimension_numbers<[2], [2], [1], [1], [0, 0, 0, 1, 1, 1], [0], [0]>} : vector<4x16x16xbf16>, vector<4x16x16xbf16>, vector<4x16x16xf32> -> vector<4x16x16xf32>
    "tpu.trace_stop"() : () -> ()
    %68 = vector.shape_cast %7 : vector<16x16xf32> to vector<1x16x16xf32>
    %69 = vector.broadcast %68 : vector<1x16x16xf32> to vector<4x16x16xf32>
    %70 = arith.addf %67, %69 : vector<4x16x16xf32>
    %cst_18 = arith.constant dense<0xFF800000> : vector<4x16xf32>
    %71 = vector.multi_reduction <maximumf>, %70, %cst_18 [2] : vector<4x16x16xf32> to vector<4x16xf32>
    %72 = vector.shape_cast %71 : vector<4x16xf32> to vector<4x16x1xf32>
    %73 = vector.broadcast %72 : vector<4x16x1xf32> to vector<4x16x16xf32>
    %74 = arith.subf %70, %73 : vector<4x16x16xf32>
    %75 = math.exp %74 : vector<4x16x16xf32>
    %cst_19 = arith.constant dense<0.000000e+00> : vector<4x16xf32>
    %76 = vector.multi_reduction <add>, %75, %cst_19 [2] : vector<4x16x16xf32> to vector<4x16xf32>
    %77 = vector.shape_cast %76 : vector<4x16xf32> to vector<4x16x1xf32>
    %78 = arith.truncf %75 : vector<4x16x16xf32> to vector<4x16x16xbf16>
    "tpu.trace_start"() <{level = 10 : i32, message = "hqk,hkd->hqd"}> : () -> ()
    %cst_20 = arith.constant dense<0.000000e+00> : vector<4x16x16xf32>
    %79 = tpu.matmul %78, %66, %cst_20 {dimension_numbers = #tpu.dot_dimension_numbers<[2], [1], [1], [2], [0, 0, 0, 1, 1, 2], [0], [0]>} : vector<4x16x16xbf16>, vector<4x16x16xbf16>, vector<4x16x16xf32> -> vector<4x16x16xf32>
    "tpu.trace_stop"() : () -> ()
    %80 = tpu.reciprocal %77 {approx = true} : vector<4x16x1xf32> -> vector<4x16x1xf32>
    %81 = vector.broadcast %80 : vector<4x16x1xf32> to vector<4x16x16xf32>
    %82 = arith.mulf %79, %81 : vector<4x16x16xf32>
    %83 = vector.extract_strided_slice %82 {offsets = [0, 0, 0], sizes = [1, 16, 16], strides = [1, 1, 1]} : vector<4x16x16xf32> to vector<1x16x16xf32>
    %84 = vector.shape_cast %83 : vector<1x16x16xf32> to vector<16x16xf32>
    %85 = vector.extract_strided_slice %82 {offsets = [1, 0, 0], sizes = [1, 16, 16], strides = [1, 1, 1]} : vector<4x16x16xf32> to vector<1x16x16xf32>
    %86 = vector.shape_cast %85 : vector<1x16x16xf32> to vector<16x16xf32>
    %87 = vector.extract_strided_slice %82 {offsets = [2, 0, 0], sizes = [1, 16, 16], strides = [1, 1, 1]} : vector<4x16x16xf32> to vector<1x16x16xf32>
    %88 = vector.shape_cast %87 : vector<1x16x16xf32> to vector<16x16xf32>
    %89 = vector.extract_strided_slice %82 {offsets = [3, 0, 0], sizes = [1, 16, 16], strides = [1, 1, 1]} : vector<4x16x16xf32> to vector<1x16x16xf32>
    %90 = vector.shape_cast %89 : vector<1x16x16xf32> to vector<16x16xf32>
    %91 = tpu.concatenate %84, %86, %88, %90 in 1 : vector<16x16xf32>, vector<16x16xf32>, vector<16x16xf32>, vector<16x16xf32> -> vector<16x64xf32>
    %92 = arith.truncf %91 : vector<16x64xf32> to vector<16x64xbf16>
    %c0_21 = arith.constant 0 : index
    %c0_22 = arith.constant 0 : index
    %93 = vector.load %arg6[%c0_21, %c0_22] : memref<64x64xbf16, #tpu.memory_space<vmem>>, vector<64x64xbf16>
    %cst_23 = arith.constant dense<0.000000e+00> : vector<16x64xf32>
    %94 = tpu.matmul %92, %93, %cst_23 {dimension_numbers = #tpu.dot_dimension_numbers<[1], [0], [0], [1], [0, 0, 1, 1], [], []>} : vector<16x64xbf16>, vector<64x64xbf16>, vector<16x64xf32> -> vector<16x64xf32>
    %c0_24 = arith.constant 0 : index
    %c0_25 = arith.constant 0 : index
    %95 = vector.load %arg7[%c0_24, %c0_25] : memref<1x64xf32, #tpu.memory_space<vmem>>, vector<1x64xf32>
    %96 = vector.broadcast %95 : vector<1x64xf32> to vector<16x64xf32>
    %97 = arith.addf %94, %96 : vector<16x64xf32>
    %98 = arith.addf %1, %97 : vector<16x64xf32>
    %c0_26 = arith.constant 0 : index
    %c0_27 = arith.constant 0 : index
    %99 = vector.load %arg8[%c0_26, %c0_27] : memref<1x64xf32, #tpu.memory_space<vmem>>, vector<1x64xf32>
    %c0_28 = arith.constant 0 : index
    %c0_29 = arith.constant 0 : index
    %100 = vector.load %arg9[%c0_28, %c0_29] : memref<1x64xf32, #tpu.memory_space<vmem>>, vector<1x64xf32>
    %cst_30 = arith.constant dense<0.000000e+00> : vector<16xf32>
    %101 = vector.multi_reduction <add>, %98, %cst_30 [1] : vector<16x64xf32> to vector<16xf32>
    %102 = vector.shape_cast %101 : vector<16xf32> to vector<16x1xf32>
    %cst_31 = arith.constant 6.400000e+01 : f32
    %103 = vector.broadcast %cst_31 : f32 to vector<16x1xf32>
    %104 = arith.divf %102, %103 : vector<16x1xf32>
    %105 = vector.broadcast %104 : vector<16x1xf32> to vector<16x64xf32>
    %106 = arith.subf %98, %105 : vector<16x64xf32>
    %107 = arith.mulf %106, %106 : vector<16x64xf32>
    %cst_32 = arith.constant dense<0.000000e+00> : vector<16xf32>
    %108 = vector.multi_reduction <add>, %107, %cst_32 [1] : vector<16x64xf32> to vector<16xf32>
    %109 = vector.shape_cast %108 : vector<16xf32> to vector<16x1xf32>
    %cst_33 = arith.constant 6.400000e+01 : f32
    %110 = vector.broadcast %cst_33 : f32 to vector<16x1xf32>
    %111 = arith.divf %109, %110 : vector<16x1xf32>
    %cst_34 = arith.constant 9.99999974E-6 : f32
    %112 = vector.broadcast %cst_34 : f32 to vector<16x1xf32>
    %113 = arith.addf %111, %112 : vector<16x1xf32>
    %114 = math.rsqrt %113 : vector<16x1xf32>
    %115 = vector.broadcast %114 : vector<16x1xf32> to vector<16x64xf32>
    %116 = arith.mulf %106, %115 : vector<16x64xf32>
    %117 = vector.broadcast %99 : vector<1x64xf32> to vector<16x64xf32>
    %118 = arith.mulf %116, %117 : vector<16x64xf32>
    %119 = vector.broadcast %100 : vector<1x64xf32> to vector<16x64xf32>
    %120 = arith.addf %118, %119 : vector<16x64xf32>
    %121 = arith.truncf %120 : vector<16x64xf32> to vector<16x64xbf16>
    %c0_35 = arith.constant 0 : index
    %c0_36 = arith.constant 0 : index
    %122 = vector.load %arg10[%c0_35, %c0_36] : memref<64x128xbf16, #tpu.memory_space<vmem>>, vector<64x128xbf16>
    %cst_37 = arith.constant dense<0.000000e+00> : vector<16x128xf32>
    %123 = tpu.matmul %121, %122, %cst_37 {dimension_numbers = #tpu.dot_dimension_numbers<[1], [0], [0], [1], [0, 0, 1, 1], [], []>} : vector<16x64xbf16>, vector<64x128xbf16>, vector<16x128xf32> -> vector<16x128xf32>
    %c0_38 = arith.constant 0 : index
    %c0_39 = arith.constant 0 : index
    %124 = vector.load %arg11[%c0_38, %c0_39] : memref<1x128xf32, #tpu.memory_space<vmem>>, vector<1x128xf32>
    %125 = vector.broadcast %124 : vector<1x128xf32> to vector<16x128xf32>
    %126 = arith.addf %123, %125 : vector<16x128xf32>
    %cst_40 = arith.constant 1.702000e+00 : f32
    %127 = vector.broadcast %cst_40 : f32 to vector<16x128xf32>
    %128 = arith.mulf %127, %126 : vector<16x128xf32>
    %129 = arith.negf %128 : vector<16x128xf32>
    %130 = math.exp %129 : vector<16x128xf32>
    %cst_41 = arith.constant 1.000000e+00 : f32
    %131 = vector.broadcast %cst_41 : f32 to vector<16x128xf32>
    %132 = arith.addf %131, %130 : vector<16x128xf32>
    %133 = arith.divf %131, %132 : vector<16x128xf32>
    %134 = arith.mulf %126, %133 : vector<16x128xf32>
    %135 = arith.truncf %134 : vector<16x128xf32> to vector<16x128xbf16>
    %c0_42 = arith.constant 0 : index
    %c0_43 = arith.constant 0 : index
    %136 = vector.load %arg12[%c0_42, %c0_43] : memref<128x64xbf16, #tpu.memory_space<vmem>>, vector<128x64xbf16>
    %cst_44 = arith.constant dense<0.000000e+00> : vector<16x64xf32>
    %137 = tpu.matmul %135, %136, %cst_44 {dimension_numbers = #tpu.dot_dimension_numbers<[1], [0], [0], [1], [0, 0, 1, 1], [], []>} : vector<16x128xbf16>, vector<128x64xbf16>, vector<16x64xf32> -> vector<16x64xf32>
    %c0_45 = arith.constant 0 : index
    %c0_46 = arith.constant 0 : index
    %138 = vector.load %arg13[%c0_45, %c0_46] : memref<1x64xf32, #tpu.memory_space<vmem>>, vector<1x64xf32>
    %139 = vector.broadcast %138 : vector<1x64xf32> to vector<16x64xf32>
    %140 = arith.addf %137, %139 : vector<16x64xf32>
    %141 = arith.addf %98, %140 : vector<16x64xf32>
    %c0_47 = arith.constant 0 : index
    %c0_48 = arith.constant 0 : index
    %c0_49 = arith.constant 0 : index
    %142 = vector.load %arg16[%c0_47, %c0_48, %c0_49] : memref<1x16x64xf32, #tpu.memory_space<vmem>>, vector<1x16x64xf32>
    %143 = vector.shape_cast %142 : vector<1x16x64xf32> to vector<16x64xf32>
    %144 = vector.shape_cast %141 : vector<16x64xf32> to vector<1x16x64xf32>
    tpu.vector_store %arg16[%c0_47, %c0_48, %c0_49], %144 {strides = array<i32>} : memref<1x16x64xf32, #tpu.memory_space<vmem>>, vector<1x16x64xf32>,
    return
  }
  func.func @transform_0(%arg0: i32) -> (i32, i32, i32) {
    %c0_i32 = arith.constant 0 : i32
    %c0_i32_0 = arith.constant 0 : i32
    %c0_i32_1 = arith.constant 0 : i32
    return %arg0, %c0_i32, %c0_i32_0 : i32, i32, i32
  }
  func.func @transform_1(%arg0: i32) -> (i32, i32) {
    %c0_i32 = arith.constant 0 : i32
    %c0_i32_0 = arith.constant 0 : i32
    %c0_i32_1 = arith.constant 0 : i32
    return %c0_i32, %c0_i32_0 : i32, i32
  }
  func.func @transform_2(%arg0: i32) -> (i32, i32) {
    %c0_i32 = arith.constant 0 : i32
    %c0_i32_0 = arith.constant 0 : i32
    %c0_i32_1 = arith.constant 0 : i32
    return %c0_i32, %c0_i32_0 : i32, i32
  }
  func.func @transform_3(%arg0: i32) -> (i32, i32) {
    %c0_i32 = arith.constant 0 : i32
    %c0_i32_0 = arith.constant 0 : i32
    %c0_i32_1 = arith.constant 0 : i32
    return %c0_i32, %c0_i32_0 : i32, i32
  }
  func.func @transform_4(%arg0: i32) -> (i32, i32) {
    %c0_i32 = arith.constant 0 : i32
    %c0_i32_0 = arith.constant 0 : i32
    %c0_i32_1 = arith.constant 0 : i32
    return %c0_i32, %c0_i32_0 : i32, i32
  }
  func.func @transform_5(%arg0: i32) -> (i32, i32) {
    %c0_i32 = arith.constant 0 : i32
    %c0_i32_0 = arith.constant 0 : i32
    %c0_i32_1 = arith.constant 0 : i32
    return %c0_i32, %c0_i32_0 : i32, i32
  }
  func.func @transform_6(%arg0: i32) -> (i32, i32) {
    %c0_i32 = arith.constant 0 : i32
    %c0_i32_0 = arith.constant 0 : i32
    %c0_i32_1 = arith.constant 0 : i32
    return %c0_i32, %c0_i32_0 : i32, i32
  }
  func.func @transform_7(%arg0: i32) -> (i32, i32) {
    %c0_i32 = arith.constant 0 : i32
    %c0_i32_0 = arith.constant 0 : i32
    %c0_i32_1 = arith.constant 0 : i32
    return %c0_i32, %c0_i32_0 : i32, i32
  }
  func.func @transform_8(%arg0: i32) -> (i32, i32) {
    %c0_i32 = arith.constant 0 : i32
    %c0_i32_0 = arith.constant 0 : i32
    %c0_i32_1 = arith.constant 0 : i32
    return %c0_i32, %c0_i32_0 : i32, i32
  }
  func.func @transform_9(%arg0: i32) -> (i32, i32) {
    %c0_i32 = arith.constant 0 : i32
    %c0_i32_0 = arith.constant 0 : i32
    %c0_i32_1 = arith.constant 0 : i32
    return %c0_i32, %c0_i32_0 : i32, i32
  }
  func.func @transform_10(%arg0: i32) -> (i32, i32) {
    %c0_i32 = arith.constant 0 : i32
    %c0_i32_0 = arith.constant 0 : i32
    %c0_i32_1 = arith.constant 0 : i32
    return %c0_i32, %c0_i32_0 : i32, i32
  }
  func.func @transform_11(%arg0: i32) -> (i32, i32) {
    %c0_i32 = arith.constant 0 : i32
    %c0_i32_0 = arith.constant 0 : i32
    %c0_i32_1 = arith.constant 0 : i32
    return %c0_i32, %c0_i32_0 : i32, i32
  }
  func.func @transform_12(%arg0: i32) -> (i32, i32) {
    %c0_i32 = arith.constant 0 : i32
    %c0_i32_0 = arith.constant 0 : i32
    %c0_i32_1 = arith.constant 0 : i32
    return %c0_i32, %c0_i32_0 : i32, i32
  }
  func.func @transform_13(%arg0: i32) -> (i32, i32) {
    %c0_i32 = arith.constant 0 : i32
    %c0_i32_0 = arith.constant 0 : i32
    %c0_i32_1 = arith.constant 0 : i32
    return %c0_i32, %c0_i32_0 : i32, i32
  }
  func.func @transform_14(%arg0: i32) -> (i32, i32) {
    %c0_i32 = arith.constant 0 : i32
    %c0_i32_0 = arith.constant 0 : i32
    %c0_i32_1 = arith.constant 0 : i32
    return %c0_i32, %c0_i32_0 : i32, i32
  }
  func.func @transform_15(%arg0: i32) -> (i32, i32, i32) {
    %c0_i32 = arith.constant 0 : i32
    %c0_i32_0 = arith.constant 0 : i32
    %c0_i32_1 = arith.constant 0 : i32
    return %arg0, %c0_i32, %c0_i32_0 : i32, i32, i32
  }
}

</mosaic_0001>

<bundles_post_ra>
// kernel: tpu_custom_call.1
= control target key start
LH: loop header
LB: loop body
LE: loop exit
PB: predicated region body
PF: predicated region fallthrough
CT: control target
= control target key end

     0   :  { %20 = vsyncpa [#allocation3], 0  ;;  %s2576_s0 = inlined_call_operand.vmem [shape: f32[2,16,64], index: 0, kind: input, shape index: {}]   ;;  %s2577_s1 = inlined_call_operand.vmem [shape: f32[1,64], index: 1, kind: input, shape index: {}]   ;;  %s2578_s2 = inlined_call_operand.vmem [shape: f32[1,64], index: 2, kind: input, shape index: {}]   ;;  %s2579_s3 = inlined_call_operand.vmem [shape: bf16[64,192], index: 3, kind: input, shape index: {}]   ;;  %s2580_s4 = inlined_call_operand.vmem [shape: f32[1,192], index: 4, kind: input, shape index: {}]   ;;  %s2581_s5 = inlined_call_operand.hbm [shape: bf16[64,64], index: 5, kind: input, shape index: {}]   ;;  %s2582_s6 = inlined_call_operand.vmem [shape: f32[1,64], index: 6, kind: input, shape index: {}]   ;;  %s2583_s7 = inlined_call_operand.vmem [shape: f32[1,64], index: 7, kind: input, shape index: {}]   ;;  %s2584_s8 = inlined_call_operand.vmem [shape: f32[1,64], index: 8, kind: input, shape index: {}]   ;;  %s2585_s9 = inlined_call_operand.hbm [shape: bf16[64,128], index: 9, kind: input, shape index: {}]   ;;  %s2586_s10 = inlined_call_operand.vmem [shape: f32[1,128], index: 10, kind: input, shape index: {}]   ;;  %s2587_s11 = inlined_call_operand.vmem [shape: bf16[128,64], index: 11, kind: input, shape index: {}]   ;;  %s2588_s12 = inlined_call_operand.vmem [shape: f32[1,64], index: 12, kind: input, shape index: {}]   ;;  %s2589_s13 = inlined_call_operand.vmem [shape: f32[1,64], index: 13, kind: input, shape index: {}]   ;;  %s2590_s14 = inlined_call_operand.vmem [shape: f32[1,64], index: 14, kind: input, shape index: {}]   ;;  %s2591_s15 = inlined_call_operand.hbm [shape: f32[2,16,64], index: 15, kind: output, shape index: {}]  }
   0x1   :  { %21 = vsyncpa [#allocation6], 0 }
   0x2   :  { %22 = vsyncpa [#allocation4], 0 }
   0x3   :  { %24 = vsyncpa [#allocation4 + $0x1], 0  ;;  %s2224_s18 = smov 0   ;;  %s2226_s19 = smov 0  }
   0x4   :  { %s2228_s20 = smov 0   ;;  %s2230_s21 = smov 0  }
   0x5 LB: > { %2596 = sst [smem:[#allocation11_spill]] %s2120_s20  ;;  %s2245_s13 = sadd.s32 4294967295, %s2124_s21   ;;  %s2124_s21 = sphi %s2230_s21, %s2608_s21   ;;  %s2120_s20 = sphi %s2228_s20, %s2610_s20   ;;  %s2116_s19 = sphi %s2226_s19, %s2612_s19   ;;  %s2112_s18 = sphi %s2224_s18, %s2611_s18  }
   0x6   : > { %s1649_s14 = sadd.s32 4294967294, %s2124_s21   ;;  %s2249_s22 = sadd.s32 1, %s2124_s21  }
   0x7   : > { %2597 = sst [smem:[#allocation12_spill]] %s2249_s22  ;;  %s357_s23 = sadd.s32 1, %s2120_s20 }
   0x8   : > { %s354_s24 = ssub.s32 %s2124_s21, %s2249_s22  ;;  %p367_p0 = scmp.ne.s32.totalorder %s2120_s20, %s2116_s19 }
   0x9   : > { %p355_p1 = scmp.eq.s32.totalorder %s354_s24, 0  ;;  %p368_p2 = scmp.eq.s32.totalorder %s2245_s13, 1 }
   0xa   : > { %p373_p3 = scmp.ne.s32.totalorder %s2116_s19, %s2112_s18  ;;  %p374_p4 = scmp.eq.s32.totalorder %s1649_s14, 1 }
   0xb   : > { %s2260_s25 = scalar_select %p355_p1, %s2120_s20, %s357_s23  }
   0xc   : > { %p2262_p5 = por %p368_p2, %p367_p0  ;;  %p2266_p6 = por %p374_p4, %p373_p3 }
   0xd   : > { %2598 = sst [smem:[#allocation13_spill]] %s2260_s25  ;;  %p1650_p7 = scmp.ge.s32.totalorder %s2124_s21, 1 }
   0xe   : > { %s2600_s27 = scalar_select %p2266_p6, 1, 0 }
   0xf   : > { %p381_p8 = scmp.lt.s32.totalorder %s2124_s21, 3  ;;  %p2593_p9 = scmp.eq.s32.totalorder %s2245_s13, 0 }
  0x10   : > { %s2126_s29 = smov [#allocation2]   ;;  %s2127_s17 = smov [#allocation5]  }
  0x11   : > { %p2273_p10 = pnand %p1650_p7, %p381_p8  ;;  %s405_s30 = sshll.u32 %s2126_s29, 4  ;;  %s406_s30 = int_to_ptr.vmem [resolvable:$true] %s405_s30 }
  0x12   : > { %s427_s14 = sshll.u32 %s2127_s17, 4  ;;  %s2015_s23 = scalar_lea.vmem %s406_s30, 512  ;;  %s428_s14 = int_to_ptr.vmem [resolvable:$true] %s427_s14 }
  0x13   : > { %p1848_p11 = pneg %p2273_p10  ;;  %p2016_p0 = scmp.ne.s32.totalorder %s406_s30, %s2015_s23 }
  0x14   : > { %p2023_p3 = scmp.lt.s32.totalorder %s406_s30, %s406_s30  ;;  %p2024_p4 = scmp.lt.s32.totalorder %s2015_s23, %s2015_s23 }
  0x15   : > { %p2281_p12 = pnand %p2593_p9, %p1848_p11 }
  0x16   : > { %p2025_p7 = por %p2024_p4, %p2023_p3 }
  0x17   : > { %p2006_p13 = pneg %p2281_p12 }
  0x19   : > { %p2018_p1 = pnand %p2016_p0, %p2006_p13 }
  0x1b   : > { %p2019_p2 = pneg %p2018_p1 }
  0x1d   : > { %p2026_p8 = pnand %p2025_p7, %p2019_p2 }
  0x1f   : > { %2029 = shalt.err (!%p2026_p8)
}
  0x20   : > { %s2128_s24 = smov 64   ;;  %s2129_s29 = smov 4  }
  0x21   : > { %1851 = dma.hbm_to_vmem [thread:$0]  (!%p2281_p12), %s2581_s5, 512, %s406_s30, [#allocation3], %s2128_s24, %s2128_s24, %s2129_s29  }
  0x22   : > { %s2041_s20 = scalar_lea.vmem %s428_s14, 512  ;;  %p2049_p9 = scmp.lt.s32.totalorder %s428_s14, %s428_s14 }
  0x23   : > { %p2042_p11 = scmp.ne.s32.totalorder %s428_s14, %s2041_s20  ;;  %p2050_p6 = scmp.lt.s32.totalorder %s2041_s20, %s2041_s20 }
  0x25   : > { %p2044_p0 = pnand %p2042_p11, %p2006_p13  ;;  %p2051_p3 = por %p2050_p6, %p2049_p9 }
  0x27   : > { %p2045_p1 = pneg %p2044_p0 }
  0x29   : > { %p2052_p2 = pnand %p2051_p3, %p2045_p1 }
  0x2b   : > { %2055 = shalt.err (!%p2052_p2)
}
  0x2c   : > { %1854 = dma.hbm_to_vmem [thread:$0]  (!%p2281_p12), %s2585_s9, 512, %s428_s14, [#allocation6], %s2128_s24, %s2128_s24, %s2129_s29  }
  0x2d   : > { %466 = sbr.rel (%p2273_p10) target bundleno = 2465 (0x9a1), region = 80  ;;  %p2603_p4 = scmp.eq.s32.totalorder (!%p2273_p10), %s2245_s13, 0 }
  0x32   : > { %2099 = dma.done.wait (%p2603_p4), [#allocation3], 512   ;;  %p2604_p13 = pmov %p2603_p4 }
  0x33   : > { %p2605_p7 = pmov %p2603_p4 }
  0x34   : > { %2101 = vsyncadd (%p2604_p13), [#allocation3], 4294966784 }
  0x35   : > { %2103 = dma.done.wait (%p2605_p7), [#allocation6], 512   ;;  %p2606_p6 = pmov %p2603_p4 }
  0x36   : > { %p518_p9 = scmp.lt.s32.totalorder %s2245_s13, 1  ;;  %vm537_vm0 = vcmask 523264   ;;  %v1928_v14 = vld [vmem:[%s2579_s3 + $0x34] ss:$8 sps:$4 sm:$0xff]   ;;  %v1930_v15 = vld [vmem:[%s2579_s3 + $0x30] ss:$8 sps:$4 sm:$0xff]   ;;  %v526_v40 = vlaneseq }
  0x37   : > { %2105 = vsyncadd (%p2606_p6), [#allocation6], 4294966784  ;;  %v1931_v16 = vld [vmem:[%s2579_s3 + $0x24] ss:$8 sps:$4 sm:$0xff]   ;;  %653 = vmatprep.subr.bf16.mxu1 %v1928_v14  ;;  %v1933_v17 = vld [vmem:[%s2579_s3 + $0x20] ss:$8 sps:$4 sm:$0xff]  }
  0x38   : > { %s519_s20 = scalar_select %p518_p9, %s2245_s13, 1  ;;  %654 = vmatpush1.bf16.msra.mxu1 %v1930_v15  ;;  %v2130_v18 = vmov 0   ;;  %v1934_v19 = vld [vmem:[%s2579_s3 + $0x14] ss:$8 sps:$4 sm:$0xff]   ;;  %v1936_v20 = vld [vmem:[%s2579_s3 + $0x10] ss:$8 sps:$4 sm:$0xff]  }
  0x39   : > { %677 = vmatprep.mubr.bf16.mxu1 %v2130_v18  ;;  %655 = vmatprep.subr.bf16.mxu1 %v1931_v16  ;;  %v1937_v21 = vld [vmem:[%s2579_s3 + $0x4] ss:$8 sps:$4 sm:$0xff]   ;;  %v1939_v22 = vld [vmem:[%s2579_s3] ss:$8 sps:$4 sm:$0xff]   ;;  %v2362_v41 = vshrl.u32 %v526_v40, 7  ;;  %v2131_v48 = vmov 0.0  }
  0x3a   : > { %s1709_s22 = sshll.u32 %s519_s20, 4  ;;  %v1660_v31 = vld [vmem:[%s2577_s1] ss:$0 sm:$0xff]  ;;  %1758 = vmatprep.subr.bf16.mxu0 %v2131_v48  ;;  %vm2132_vm1 = vmmov 0   ;;  %s2133_s16 = smov 96   ;;  %vm709_vm2 = vcmask 130048  }
  0x3b   : > { %s522_s30 = scalar_lea.vmem %s2576_s0, %s1709_s22  ;;  %v1661_v35 = vld [vmem:[%s2578_s2] ss:$0 sm:$0xff]  ;;  %v594_v42 = vsub.s32 0, %v2362_v41  ;;  %1760 = vmatprep.mubr.msk.bf16.mxu0 %vm2132_vm1, %v2131_v48  ;;  %s2134_s14 = smov 112   ;;  %v598_v52 = vsub.s32 1, %v2362_v41  ;;  %vm1198_vm5 = vcmask 261120  }
  0x3c   : > { %v2318_v0 = vld [vmem:[%s522_s30] sm:$0xff]  ;;  %v2320_v1 = vld [vmem:[%s522_s30 + $0x8] sm:$0xff]  ;;  %656 = vmatpush1.bf16.msra.mxu1 %v1933_v17  ;;  %s2135_s24 = smov 80   ;;  %s2136_s29 = smov 64   ;;  %vm1201_vm6 = vcmask 392192  }
  0x3d   : > { %v538_v2 = vsel %vm537_vm0, %v2318_v0, 0.0  ;;  %v541_v3 = vsel %vm537_vm0, %v2320_v1, 0.0  ;;  %657 = vmatprep.subr.bf16.mxu1 %v1934_v19  ;;  %v590_v43 = vld [vmem:[%s2580_s4] sm:$0x3]  ;;  %s2138_s17 = smov 16   ;;  %s2139_s23 = smov 32  }
  0x3e   : > { %539 = vadd.xlane.f32.xlu0 %v538_v2  ;;  %v595_v45 = vrot.slane %v590_v43, %v594_v42  ;;  %v599_v54 = vrot.slane %v590_v43, %v598_v52  ;;  %s2140_s20 = smov 48   ;;  %s515_s28 = sand.u32 1, %s2116_s19  }
  0x3f   : > { %s2141_s30 = smov [#allocation7]  }
  0x40   : > { %658 = vmatpush1.bf16.msra.mxu1 %v1936_v20 }
  0x41   : > { %659 = vmatprep.subr.bf16.mxu1 %v1937_v21 }
  0x42   : > { %542 = vadd.xlane.f32.xlu0 %v541_v3 }
  0x44   : > { %660 = vmatpush1.bf16.msra.mxu1 %v1939_v22 }
  0x45   : > { %1746 = vmatprep.subr.bf16.mxu1 %v2131_v48 }
  0xc7   : > { %v540_v4 = vpop.xlane.xlu0 %539 }
  0xc8   : > { %v545_v5 = vmul.f32 0.015625, %v540_v4 }
  0xca   : > { %v547_v6 = vsub.f32 %v2318_v0, %v545_v5 }
  0xcb   : > { %v543_v7 = vpop.xlane.xlu0 %542 }
  0xcc   : > { %v546_v8 = vmul.f32 0.015625, %v543_v7  ;;  %v549_v9 = vmul.f32 %v547_v6, %v547_v6 }
  0xce   : > { %v548_v10 = vsub.f32 %v2320_v1, %v546_v8  ;;  %v551_v11 = vsel %vm537_vm0, %v549_v9, 0.0  ;;  %v530_v8 = vand.u32 127, %v526_v40  ;;  %v528_v9 = vadd.s32 8, %v2362_v41 }
  0xcf   : > { %552 = vadd.xlane.f32.xlu1 %v551_v11 }
  0xd0   : > { %v550_v12 = vmul.f32 %v548_v10, %v548_v10  ;;  %vm531_vm3 = vcmp.ge.s32.totalorder %v2362_v41, %v530_v8  ;;  %vm532_vm4 = vcmp.ge.s32.totalorder %v528_v9, %v530_v8 }
  0xd2   : > { %v554_v13 = vsel %vm537_vm0, %v550_v12, 0.0 }
  0xd3   : > { %555 = vadd.xlane.f32.xlu1 %v554_v13 }
 0x158   : > { %v553_v23 = vpop.xlane.xlu1 %552 }
 0x159   : > { %v557_v24 = vmul.f32 0.015625, %v553_v23 }
 0x15b   : > { %v559_v25 = vadd.f32 1e-05, %v557_v24 }
 0x15c   : > { %v556_v26 = vpop.xlane.xlu1 %555 }
 0x15d   : > { %1956 = vrsqrt.f32 %v559_v25  ;;  %v558_v27 = vmul.f32 0.015625, %v556_v26 }
 0x15f   : > { %v560_v28 = vadd.f32 1e-05, %v558_v27 }
 0x161   : > { %1958 = vrsqrt.f32 %v560_v28 }
 0x16a   : > { %v1957_v29 = vpop.eup %1956 }
 0x16b   : > { %v563_v30 = vmul.f32 %v1957_v29, %v547_v6 }
 0x16d   : > { %v571_v34 = vmul.f32 %v1660_v31, %v563_v30 }
 0x16e   : > { %v1959_v32 = vpop.eup %1958 }
 0x16f   : > { %v564_v33 = vmul.f32 %v1959_v32, %v548_v10  ;;  %v579_v37 = vadd.f32 %v1661_v35, %v571_v34  ;;  %v2137_v10 = vmov -inf  }
 0x170   : > { %v533_v11 = vsel %vm531_vm3, 0.0, %v2137_v10  ;;  %v534_v15 = vsel %vm532_vm4, 0.0, %v2137_v10 }
 0x171   : > { %v572_v36 = vmul.f32 %v1660_v31, %v564_v33 }
 0x173   : > { %v580_v38 = vadd.f32 %v1661_v35, %v572_v36 }
 0x175   : > { %v581_v39 = vpack.c.bf16 %v580_v38, %v579_v37 }
 0x177   : > { %1670 = vmatmul.mubr.msk.bf16.vlgmr.msra.gmra.mxu1 %vm537_vm0, %v581_v39 }
 0x178   : > { %1748 = vmatprep.mubr.msk.bf16.mxu1 %vm2132_vm1, %v2131_v48 }
 0x237   : > { %v679_v44 = vpop.f32.mrf.mxu1 }
 0x238   : > { %v680_v49 = vadd.f32 %v679_v44, %v595_v45 }
 0x239   : > { %v681_v46 = vpop.f32.mrf.mxu1 }
 0x23a   : > { %v682_v58 = vadd.f32 %v681_v46, %v599_v54 }
 0x23b   : > { %v683_v47 = vpop.f32.mrf.mxu1 }
 0x23c   : > { %v684_v50 = vadd.f32 %v683_v47, %v595_v45 }
 0x23d   : > { %v685_v53 = vpop.f32.mrf.mxu1 }
 0x23e   : > { %v688_v51 = vpack.c.bf16 %v684_v50, %v680_v49  ;;  %v686_v55 = vadd.f32 %v685_v53, %v599_v54 }
 0x240   : > { %693 = vrot.lane.b32.xlu1 %v688_v51, %s2133_s16  ;;  %691 = vrot.lane.b32.xlu0 %v688_v51, %s2134_s14  ;;  %v2377_v59 = vpack.c.bf16 %v686_v55, %v682_v58 }
 0x244   : > { %695 = vrot.lane.b32.xlu1 %v688_v51, %s2135_s24 }
 0x248   : > { %707 = vrot.lane.b32.xlu1 %v688_v51, %s2136_s29 }
 0x2b2   : > { %v694_v56 = vpop.permute.xlu1 %693  ;;  %v692_v57 = vpop.permute.xlu0 %691 }
 0x2b3   : > { %806 = vrot.lane.b32.xlu1 %v694_v56, %s2136_s29  ;;  %757 = vrot.lane.b32.xlu0 %v692_v57, %s2136_s29 }
 0x2b6   : > { %v696_v60 = vpop.permute.xlu1 %695 }
 0x2b7   : > { %698 = vrot.lane.b32.xlu1 %v2377_v59, %s2134_s14  ;;  %855 = vrot.lane.b32.xlu0 %v696_v60, %s2136_s29  ;;  %s1657_s14 = sshll.u32 %s515_s28, 4 }
 0x2b8   : > { %s517_s29 = scalar_lea.vmem [#allocation7], %s1657_s14 }
 0x2ba   : > { %v708_v61 = vpop.permute.xlu1 %707 }
 0x2bb   : > { %v714_v62 = vsel %vm709_vm2, %v708_v61, 0 }
 0x2bc   : > { %1747 = vmatpush3.bf16.xpose.msra.mxu1 %v714_v62 }
 0x2bd   : > { %1752 = vmatprep.subr.bf16.mxu1 %v2131_v48 }
 0x2c3   : > { %1749 = vmatmul.mubr.msk.bf16.vlgmr.msra.gmra.mxu1 %vm709_vm2, %v688_v51 }
 0x2c4   : > { %1754 = vmatprep.mubr.msk.bf16.mxu1 %vm2132_vm1, %v2131_v48 }
 0x325   : > { %v807_v63 = vpop.permute.xlu1 %806  ;;  %v758_v2 = vpop.permute.xlu0 %757 }
 0x326   : > { %v763_v3 = vsel %vm709_vm2, %v758_v2, 0  ;;  %v812_v4 = vsel %vm709_vm2, %v807_v63, 0 }
 0x327   : > { %1753 = vmatpush3.bf16.xpose.msra.mxu1 %v763_v3  ;;  %1759 = vmatpush3.bf16.xpose.msra.mxu0 %v812_v4 }
 0x328   : > { %1764 = vmatprep.subr.bf16.mxu1 %v2131_v48  ;;  %1770 = vmatprep.subr.bf16.mxu0 %v2131_v48 }
 0x329   : > { %v856_v5 = vpop.permute.xlu0 %855  ;;  %v699_v7 = vpop.permute.xlu1 %698 }
 0x32a   : > { %v861_v6 = vsel %vm709_vm2, %v856_v5, 0 }
 0x32e   : > { %1755 = vmatmul.mubr.msk.bf16.vlgmr.msra.gmra.mxu1 %vm709_vm2, %v692_v57  ;;  %1761 = vmatmul.mubr.msk.bf16.vlgmr.msra.gmra.mxu0 %vm709_vm2, %v694_v56 }
 0x32f   : > { %1765 = vmatpush3.bf16.xpose.msra.mxu1 %v861_v6  ;;  %1771 = vmatpush3.bf16.msra.mxu0 %v2377_v59 }
 0x330   : > { %1766 = vmatprep.mubr.msk.bf16.mxu1 %vm2132_vm1, %v2131_v48  ;;  %1776 = vmatprep.subr.bf16.mxu1 %v2131_v48 }
 0x331   : > { %1772 = vmatprep.mubr.msk.bf16.mxu0 %vm2132_vm1, %v2131_v48  ;;  %1782 = vmatprep.subr.bf16.mxu0 %v2131_v48 }
 0x336   : > { %1767 = vmatmul.mubr.msk.bf16.vlgmr.msra.gmra.mxu1 %vm709_vm2, %v696_v60 }
 0x337   : > { %1777 = vmatpush3.bf16.msra.mxu1 %v699_v7  ;;  %1778 = vmatprep.mubr.msk.bf16.mxu1 %vm2132_vm1, %v2131_v48 }
 0x338   : > { %1788 = vmatprep.subr.bf16.mxu1 %v2131_v48 }
 0x383   : > { %v750_v12 = vpop.f32.mrf.mxu1 }
 0x384   : > { %v751_v13 = vadd.f32 %v750_v12, %v533_v11 }
 0x385   : > { %v1750_v14 = vpop.f32.mrf.mxu1 }
 0x386   : > { %v904_v16 = vsel %vm709_vm2, %v751_v13, -inf }
 0x387   : > { %905 = vmax.xlane.f32.xlu1 %v904_v16  ;;  %v753_v17 = vpop.f32.mrf.mxu1 }
 0x388   : > { %v754_v18 = vadd.f32 %v753_v17, %v534_v15 }
 0x389   : > { %v1751_v19 = vpop.f32.mrf.mxu1 }
 0x38a   : > { %v907_v20 = vsel %vm709_vm2, %v754_v18, -inf }
 0x38b   : > { %908 = vmax.xlane.f32.xlu0 %v907_v20 }
 0x3ee   : > { %v799_v21 = vpop.f32.mrf.mxu1  ;;  %v848_v22 = vpop.f32.mrf.mxu0 }
 0x3ef   : > { %v800_v23 = vadd.f32 %v799_v21, %v533_v11  ;;  %v849_v24 = vadd.f32 %v848_v22, %v533_v11 }
 0x3f0   : > { %v1756_v25 = vpop.f32.mrf.mxu1  ;;  %v1762_v26 = vpop.f32.mrf.mxu0 }
 0x3f1   : > { %v916_v27 = vsel %vm709_vm2, %v849_v24, -inf  ;;  %v910_v28 = vsel %vm709_vm2, %v800_v23, -inf }
 0x3f2   : > { %917 = vmax.xlane.f32.xlu1 %v916_v27  ;;  %v851_v29 = vpop.f32.mrf.mxu0  ;;  %911 = vmax.xlane.f32.xlu0 %v910_v28  ;;  %v802_v30 = vpop.f32.mrf.mxu1 }
 0x3f3   : > { %v803_v31 = vadd.f32 %v802_v30, %v534_v15  ;;  %v852_v34 = vadd.f32 %v851_v29, %v534_v15  ;;  %v1940_v30 = vld [vmem:[#allocation2 + $0x18] sm:$0xff]  }
 0x3f4   : > { %v1757_v32 = vpop.f32.mrf.mxu1  ;;  %v1763_v33 = vpop.f32.mrf.mxu0 }
 0x3f5   : > { %v913_v35 = vsel %vm709_vm2, %v803_v31, -inf  ;;  %v919_v39 = vsel %vm709_vm2, %v852_v34, -inf }
 0x3f6   : > { %914 = vmax.xlane.f32.xlu0 %v913_v35  ;;  %v897_v36 = vpop.f32.mrf.mxu1 }
 0x3f7   : > { %v898_v37 = vadd.f32 %v897_v36, %v533_v11 }
 0x3f8   : > { %v1768_v38 = vpop.f32.mrf.mxu1 }
 0x3f9   : > { %v922_v40 = vsel %vm709_vm2, %v898_v37, -inf }
 0x3fa   : > { %920 = vmax.xlane.f32.xlu0 %v919_v39  ;;  %923 = vmax.xlane.f32.xlu1 %v922_v40  ;;  %v900_v41 = vpop.f32.mrf.mxu1 }
 0x3fb   : > { %v901_v42 = vadd.f32 %v900_v41, %v534_v15  ;;  %v1941_v41 = vld [vmem:[#allocation2 + $0x10] sm:$0xff]  }
 0x3fc   : > { %v1769_v43 = vpop.f32.mrf.mxu1 }
 0x3fd   : > { %v925_v44 = vsel %vm709_vm2, %v901_v42, -inf  ;;  %v1942_v43 = vld [vmem:[#allocation2 + $0x8] sm:$0xff]  }
 0x3fe   : > { %926 = vmax.xlane.f32.xlu0 %v925_v44 }
 0x40b   : > { %704 = vrot.lane.b32.xlu1 %v2377_v59, %s2135_s24  ;;  %s1710_s24 = sshll.u32 %s2245_s13, 8  ;;  %s2536_s13 = scalar_lea.sflag [#allocation4], %s515_s28 }
 0x40c   : > { %s2530_s22 = scalar_lea.hbm %s2591_s15, %s1710_s24 }
 0x410   : > { %v906_v45 = vpop.xlane.xlu1 %905 }
 0x411   : > { %v928_v46 = vsub.f32 %v751_v13, %v906_v45 }
 0x413   : > { %v936_v47 = vmul.f32 1.442695, %v928_v46 }
 0x414   : > { %701 = vrot.lane.b32.xlu0 %v2377_v59, %s2133_s16  ;;  %v909_v49 = vpop.xlane.xlu0 %908  ;;  %s2060_s16 = sshll.u32 %s2141_s30, 4  ;;  %s2061_s16 = int_to_ptr.vmem [resolvable:$false] %s2060_s16 }
 0x415   : > { %v929_v50 = vsub.f32 %v754_v18, %v909_v49  ;;  %1960 = vpow2.f32 %v936_v47  ;;  %s2062_s14 = scalar_lea.vmem %s2061_s16, 512 }
 0x417   : > { %v938_v51 = vmul.f32 1.442695, %v929_v50 }
 0x419   : > { %1962 = vpow2.f32 %v938_v51 }
 0x422   : > { %v1961_v52 = vpop.eup %1960 }
 0x423   : > { %v952_v26 = vsel %vm709_vm2, %v1961_v52, 0.0 }
 0x426   : > { %v2418_v53 = vpop.eup %1962 }
 0x427   : > { %v976_v54 = vpack.c.bf16 %v2418_v53, %v1961_v52  ;;  %v955_v29 = vsel %vm709_vm2, %v2418_v53, 0.0  ;;  %v1943_v52 = vld [vmem:[#allocation2] sm:$0xff]  }
 0x429   : > { %1773 = vmatmul.mubr.msk.bf16.vlgmr.msra.gmra.mxu0 %vm709_vm2, %v976_v54 }
 0x42a   : > { %1784 = vmatprep.mubr.msk.bf16.mxu0 %vm2132_vm1, %v2131_v48 }
 0x47b   : > { %v918_v55 = vpop.xlane.xlu1 %917  ;;  %v912_v56 = vpop.xlane.xlu0 %911 }
 0x47c   : > { %v932_v57 = vsub.f32 %v849_v24, %v918_v55  ;;  %v930_v58 = vsub.f32 %v800_v23, %v912_v56 }
 0x47e   : > { %v944_v59 = vmul.f32 1.442695, %v932_v57  ;;  %v940_v60 = vmul.f32 1.442695, %v930_v58 }
 0x47f   : > { %v915_v61 = vpop.xlane.xlu0 %914 }
 0x480   : > { %1964 = vpow2.f32 %v944_v59  ;;  %v931_v62 = vsub.f32 %v803_v31, %v915_v61 }
 0x481   : > { %1966 = vpow2.f32 %v940_v60 }
 0x482   : > { %v942_v63 = vmul.f32 1.442695, %v931_v62 }
 0x483   : > { %v924_v2 = vpop.xlane.xlu1 %923  ;;  %v921_v3 = vpop.xlane.xlu0 %920 }
 0x484   : > { %1968 = vpow2.f32 %v942_v63  ;;  %v934_v4 = vsub.f32 %v898_v37, %v924_v2  ;;  %v933_v5 = vsub.f32 %v852_v34, %v921_v3 }
 0x486   : > { %v948_v6 = vmul.f32 1.442695, %v934_v4  ;;  %v946_v7 = vmul.f32 1.442695, %v933_v5 }
 0x487   : > { %v927_v8 = vpop.xlane.xlu0 %926  ;;  %v705_v19 = vpop.permute.xlu1 %704 }
 0x488   : > { %1970 = vpow2.f32 %v948_v6  ;;  %v935_v9 = vsub.f32 %v901_v42, %v927_v8 }
 0x489   : > { %1972 = vpow2.f32 %v946_v7 }
 0x48a   : > { %v950_v10 = vmul.f32 1.442695, %v935_v9 }
 0x48b   : > { %v702_v11 = vpop.permute.xlu0 %701 }
 0x48c   : > { %1974 = vpow2.f32 %v950_v10  ;;  %1783 = vmatpush3.bf16.msra.mxu0 %v702_v11 }
 0x48d   : > { %v1965_v12 = vpop.eup %1964  ;;  %1794 = vmatprep.subr.bf16.mxu0 %v2131_v48 }
 0x48e   : > { %v1967_v13 = vpop.eup %1966  ;;  %v964_v14 = vsel %vm709_vm2, %v1965_v12, 0.0 }
 0x48f   : > { %965 = vadd.xlane.f32.xlu0 %v964_v14  ;;  %v958_v15 = vsel %vm709_vm2, %v1967_v13, 0.0 }
 0x490   : > { %959 = vadd.xlane.f32.xlu1 %v958_v15 }
 0x491   : > { %v1969_v16 = vpop.eup %1968 }
 0x492   : > { %v961_v17 = vsel %vm709_vm2, %v1969_v16, 0.0  ;;  %v977_v18 = vpack.c.bf16 %v1969_v16, %v1967_v13 }
 0x493   : > { %962 = vadd.xlane.f32.xlu0 %v961_v17 }
 0x494   : > { %1779 = vmatmul.mubr.msk.bf16.vlgmr.msra.gmra.mxu1 %vm709_vm2, %v977_v18 }
 0x495   : > { %v1971_v20 = vpop.eup %1970  ;;  %1789 = vmatpush3.bf16.msra.mxu1 %v705_v19  ;;  %1790 = vmatprep.mubr.msk.bf16.mxu1 %vm2132_vm1, %v2131_v48 }
 0x496   : > { %v1973_v21 = vpop.eup %1972  ;;  %v970_v22 = vsel %vm709_vm2, %v1971_v20, 0.0  ;;  %1806 = vmatprep.subr.bf16.mxu1 %v2131_v48 }
 0x497   : > { %971 = vadd.xlane.f32.xlu0 %v970_v22  ;;  %v967_v23 = vsel %vm709_vm2, %v1973_v21, 0.0  ;;  %v978_v24 = vpack.c.bf16 %v1973_v21, %v1965_v12 }
 0x498   : > { %968 = vadd.xlane.f32.xlu1 %v967_v23 }
 0x499   : > { %v1975_v25 = vpop.eup %1974  ;;  %1785 = vmatmul.mubr.msk.bf16.vlgmr.msra.gmra.mxu0 %vm709_vm2, %v978_v24 }
 0x49a   : > { %v973_v27 = vsel %vm709_vm2, %v1975_v25, 0.0  ;;  %v979_v28 = vpack.c.bf16 %v1975_v25, %v1971_v20  ;;  %1802 = vmatprep.mubr.msk.bf16.mxu0 %vm2132_vm1, %v2131_v48  ;;  %1795 = vmatpush3.bf16.msra.mxu0 %v1940_v30 }
 0x49b   : > { %953 = vadd.xlane.f32.xlu0 %v952_v26  ;;  %1796 = vmatprep.subr.bf16.mxu0 %v2131_v48 }
 0x49c   : > { %974 = vadd.xlane.f32.xlu1 %v973_v27  ;;  %1791 = vmatmul.mubr.msk.bf16.vlgmr.msra.gmra.mxu1 %vm709_vm2, %v979_v28 }
 0x49d   : > { %1814 = vmatprep.mubr.msk.bf16.mxu1 %vm2132_vm1, %v2131_v48 }
 0x49e   : > { %1797 = vmatpush3.bf16.msra.mxu0 %v1941_v41 }
 0x49f   : > { %1798 = vmatprep.subr.bf16.mxu0 %v2131_v48 }
 0x4a0   : > { %956 = vadd.xlane.f32.xlu1 %v955_v29 }
 0x4a2   : > { %1799 = vmatpush3.bf16.msra.mxu0 %v1942_v43 }
 0x4a3   : > { %1800 = vmatprep.subr.bf16.mxu0 %v2131_v48 }
 0x4a6   : > { %1801 = vmatpush3.bf16.msra.mxu0 %v1943_v52  ;;  %v1944_v52 = vld [vmem:[#allocation5 + $0x18] sm:$0xff]  }
 0x4a7   : > { %1818 = vmatprep.subr.bf16.mxu0 %v2131_v48  ;;  %1807 = vmatpush3.bf16.msra.mxu1 %v1944_v52 }
 0x4a8   : > { %1808 = vmatprep.subr.bf16.mxu1 %v2131_v48 }
 0x4e9   : > { %v2444_v31 = vpop.f32.mrf.mxu0 }
 0x4eb   : > { %v1774_v32 = vpop.f32.mrf.mxu0 }
 0x4ed   : > { %v2447_v33 = vpop.f32.mrf.mxu0 }
 0x4ef   : > { %v1775_v34 = vpop.f32.mrf.mxu0 }
 0x518   : > { %v966_v35 = vpop.xlane.xlu0 %965 }
 0x519   : > { %v960_v36 = vpop.xlane.xlu1 %959 }
 0x51a   : > { %1976 = vrcp.f32 %v960_v36 }
 0x51c   : > { %v963_v37 = vpop.xlane.xlu0 %962 }
 0x51d   : > { %1978 = vrcp.f32 %v963_v37 }
 0x51e   : > { %1980 = vrcp.f32 %v966_v35 }
 0x520   : > { %v972_v39 = vpop.xlane.xlu0 %971 }
 0x521   : > { %v969_v38 = vpop.xlane.xlu1 %968 }
 0x522   : > { %1982 = vrcp.f32 %v969_v38 }
 0x523   : > { %1984 = vrcp.f32 %v972_v39 }
 0x524   : > { %v954_v10 = vpop.xlane.xlu0 %953 }
 0x525   : > { %v975_v40 = vpop.xlane.xlu1 %974 }
 0x526   : > { %1986 = vrcp.f32 %v975_v40 }
 0x527   : > { %v1977_v45 = vpop.eup %1976  ;;  %1988 = vrcp.f32 %v954_v10 }
 0x529   : > { %v957_v11 = vpop.xlane.xlu1 %956 }
 0x52a   : > { %v1979_v46 = vpop.eup %1978  ;;  %1990 = vrcp.f32 %v957_v11  ;;  %v1948_v11 = vld [vmem:[%s2587_s11 + $0x38] sm:$0xff]  }
 0x52b   : > { %v1981_v56 = vpop.eup %1980 }
 0x52f   : > { %v1983_v58 = vpop.eup %1982 }
 0x530   : > { %v1985_v63 = vpop.eup %1984 }
 0x533   : > { %v1987_v3 = vpop.eup %1986 }
 0x534   : > { %v1989_v13 = vpop.eup %1988 }
 0x535   : > { %v1164_v20 = vmul.f32 %v1989_v13, %v2444_v31  ;;  %v1679_v31 = vld [vmem:[%s2582_s6] ss:$0 sm:$0xff]  ;;  %v1950_v13 = vld [vmem:[%s2587_s11 + $0x28] sm:$0xff]  }
 0x537   : > { %v1991_v14 = vpop.eup %1990 }
 0x538   : > { %v1165_v21 = vmul.f32 %v1991_v14, %v2447_v33  ;;  %v1951_v14 = vld [vmem:[%s2587_s11 + $0x20] sm:$0xff]  }
 0x554   : > { %v1061_v42 = vpop.f32.mrf.mxu1 }
 0x555   : > { %v1166_v49 = vmul.f32 %v1977_v45, %v1061_v42 }
 0x556   : > { %v1780_v44 = vpop.f32.mrf.mxu1 }
 0x558   : > { %v1064_v47 = vpop.f32.mrf.mxu1 }
 0x559   : > { %v1167_v50 = vmul.f32 %v1979_v46, %v1064_v47  ;;  %v1105_v51 = vpop.f32.mrf.mxu0 }
 0x55a   : > { %v1781_v53 = vpop.f32.mrf.mxu1  ;;  %v1168_v60 = vmul.f32 %v1981_v56, %v1105_v51 }
 0x55b   : > { %v1913_v54 = vpack.i.bf16 %v1167_v50, %v1166_v49  ;;  %v1786_v55 = vpop.f32.mrf.mxu0  ;;  %v1945_v53 = vld [vmem:[#allocation5 + $0x10] sm:$0xff]  }
 0x55c   : > { %v1149_v57 = vpop.f32.mrf.mxu1  ;;  %1809 = vmatpush3.bf16.msra.mxu1 %v1945_v53  ;;  %v1947_v55 = vld [vmem:[#allocation5] sm:$0xff]  }
 0x55d   : > { %v1108_v59 = vpop.f32.mrf.mxu0  ;;  %1914 = vrot.lane.b32.xlu0 %v1913_v54, %s2138_s17  ;;  %v1170_v6 = vmul.f32 %v1985_v63, %v1149_v57  ;;  %1810 = vmatprep.subr.bf16.mxu1 %v2131_v48  ;;  %v1946_v54 = vld [vmem:[#allocation5 + $0x8] sm:$0xff]   ;;  %s1565_s17 = sshll.u32 %s517_s29, 4  ;;  %s2532_s17 = int_to_ptr.vmem [resolvable:$true] %s1565_s17 }
 0x55e   : > { %v1169_v61 = vmul.f32 %v1983_v58, %v1108_v59  ;;  %v1792_v62 = vpop.f32.mrf.mxu1  ;;  %s2056_s25 = scalar_lea.vmem %s2532_s17, 256  ;;  %p2063_p11 = scmp.lt.s32.totalorder %s2532_s17, %s2061_s16 }
 0x55f   : > { %v1787_v2 = vpop.f32.mrf.mxu0  ;;  %p2057_p10 = scmp.ne.s32.totalorder %s2532_s17, %s2056_s25  ;;  %p2064_p0 = scmp.lt.s32.totalorder %s2062_s14, %s2056_s25 }
 0x560   : > { %v1918_v4 = vpack.i.bf16 %v1169_v61, %v1168_v60  ;;  %v1152_v5 = vpop.f32.mrf.mxu1  ;;  %1811 = vmatpush3.bf16.msra.mxu1 %v1946_v54  ;;  %v1685_v2 = vld [vmem:[%s2583_s7] ss:$0 sm:$0xff] }
 0x561   : > { %v1171_v7 = vmul.f32 %v1987_v3, %v1152_v5  ;;  %1812 = vmatprep.subr.bf16.mxu1 %v2131_v48  ;;  %p2058_p12 = pnand %p2057_p10, %p2262_p5  ;;  %p2065_p1 = por %p2064_p0, %p2063_p11 }
 0x562   : > { %1919 = vrot.lane.b32.xlu1 %v1918_v4, %s2139_s23  ;;  %v1793_v8 = vpop.f32.mrf.mxu1 }
 0x563   : > { %v1923_v9 = vpack.i.bf16 %v1171_v7, %v1170_v6  ;;  %v1686_v6 = vld [vmem:[%s2584_s8] ss:$0 sm:$0xff]  ;;  %p2059_p8 = pneg %p2058_p12 }
 0x564   : > { %1813 = vmatpush3.bf16.msra.mxu1 %v1947_v55 }
 0x565   : > { %p2066_p3 = pnand %p2065_p1, %p2059_p8 }
 0x566   : > { %1924 = vrot.lane.b32.xlu1 %v1923_v9, %s2140_s20 }
 0x5cf   : > { %v1915_v12 = vpop.permute.xlu0 %1914 }
 0x5d0   : > { %v1917_v16 = vunpack.i.h.bf16 %v1915_v12  ;;  %v1916_v17 = vunpack.i.l.bf16 %v1915_v12  ;;  %v1949_v12 = vld [vmem:[%s2587_s11 + $0x30] sm:$0xff]  }
 0x5d2   : > { %v1197_v23 = vsel %vm709_vm2, %v1165_v21, %v1917_v16  ;;  %v1196_v24 = vsel %vm709_vm2, %v1164_v20, %v1916_v17  ;;  %v1953_v16 = vld [vmem:[%s2587_s11 + $0x10] sm:$0xff]   ;;  %v1954_v17 = vld [vmem:[%s2587_s11 + $0x8] sm:$0xff]  }
 0x5d4   : > { %v1920_v15 = vpop.permute.xlu1 %1919 }
 0x5d5   : > { %v1922_v18 = vunpack.i.h.bf16 %v1920_v15  ;;  %v1921_v19 = vunpack.i.l.bf16 %v1920_v15  ;;  %v1952_v15 = vld [vmem:[%s2587_s11 + $0x18] sm:$0xff]  }
 0x5d7   : > { %v1199_v27 = vsel %vm1198_vm5, %v1196_v24, %v1921_v19  ;;  %v1200_v28 = vsel %vm1198_vm5, %v1197_v23, %v1922_v18  ;;  %v1955_v18 = vld [vmem:[%s2587_s11] sm:$0xff]  }
 0x5d8   : > { %v1925_v22 = vpop.permute.xlu1 %1924  ;;  %v1687_v19 = vld [vmem:[%s2586_s10] ss:$0 sm:$0xff] }
 0x5d9   : > { %v1927_v25 = vunpack.i.h.bf16 %v1925_v22  ;;  %v1926_v26 = vunpack.i.l.bf16 %v1925_v22 }
 0x5db   : > { %v1202_v29 = vsel %vm1201_vm6, %v1199_v27, %v1926_v26  ;;  %v1203_v30 = vsel %vm1201_vm6, %v1200_v28, %v1927_v25 }
 0x5dc   : > { %v1204_v32 = vpack.c.bf16 %v1203_v30, %v1202_v29 }
 0x5de   : > { %1803 = vmatmul.mubr.msk.bf16.vlgmr.msra.gmra.mxu0 %vm537_vm0, %v1204_v32 }
 0x5df   : > { %1834 = vmatprep.mubr.msk.bf16.mxu0 %vm2132_vm1, %v2131_v48  ;;  %1819 = vmatpush3.bf16.msra.mxu0 %v1948_v11 }
 0x5e0   : > { %1820 = vmatprep.subr.bf16.mxu0 %v2131_v48 }
 0x5e3   : > { %1821 = vmatpush3.bf16.msra.mxu0 %v1949_v12 }
 0x5e4   : > { %1822 = vmatprep.subr.bf16.mxu0 %v2131_v48 }
 0x5e7   : > { %1823 = vmatpush3.bf16.msra.mxu0 %v1950_v13 }
 0x5e8   : > { %1824 = vmatprep.subr.bf16.mxu0 %v2131_v48 }
 0x5eb   : > { %1825 = vmatpush3.bf16.msra.mxu0 %v1951_v14 }
 0x5ec   : > { %1826 = vmatprep.subr.bf16.mxu0 %v2131_v48 }
 0x5ef   : > { %1827 = vmatpush3.bf16.msra.mxu0 %v1952_v15 }
 0x5f0   : > { %1828 = vmatprep.subr.bf16.mxu0 %v2131_v48 }
 0x5f3   : > { %1829 = vmatpush3.bf16.msra.mxu0 %v1953_v16 }
 0x5f4   : > { %1830 = vmatprep.subr.bf16.mxu0 %v2131_v48 }
 0x5f7   : > { %1831 = vmatpush3.bf16.msra.mxu0 %v1954_v17 }
 0x5f8   : > { %1832 = vmatprep.subr.bf16.mxu0 %v2131_v48 }
 0x5fb   : > { %1833 = vmatpush3.bf16.msra.mxu0 %v1955_v18 }
 0x69e   : > { %v1281_v33 = vpop.f32.mrf.mxu0 }
 0x69f   : > { %v1282_v34 = vadd.f32 %v1679_v31, %v1281_v33 }
 0x6a0   : > { %v1804_v35 = vpop.f32.mrf.mxu0 }
 0x6a1   : > { %v2463_v36 = vadd.f32 %v1282_v34, %v2318_v0 }
 0x6a2   : > { %v1284_v37 = vpop.f32.mrf.mxu0 }
 0x6a3   : > { %v1285_v38 = vadd.f32 %v1679_v31, %v1284_v37  ;;  %v1292_v39 = vsel %vm537_vm0, %v2463_v36, 0.0 }
 0x6a4   : > { %1293 = vadd.xlane.f32.xlu1 %v1292_v39  ;;  %v1805_v40 = vpop.f32.mrf.mxu0  ;;  %v1695_v39 = vld [vmem:[%s2588_s12] ss:$0 sm:$0xff] }
 0x6a5   : > { %v2468_v41 = vadd.f32 %v1285_v38, %v2320_v1 }
 0x6a7   : > { %v1295_v42 = vsel %vm537_vm0, %v2468_v41, 0.0 }
 0x6a8   : > { %1296 = vadd.xlane.f32.xlu0 %v1295_v42 }
 0x72d   : > { %v1294_v43 = vpop.xlane.xlu1 %1293 }
 0x72e   : > { %v1298_v44 = vmul.f32 0.015625, %v1294_v43 }
 0x730   : > { %v1300_v45 = vsub.f32 %v2463_v36, %v1298_v44 }
 0x731   : > { %v1297_v0 = vpop.xlane.xlu0 %1296 }
 0x732   : > { %v1299_v46 = vmul.f32 0.015625, %v1297_v0  ;;  %v1302_v47 = vmul.f32 %v1300_v45, %v1300_v45 }
 0x734   : > { %v1301_v49 = vsub.f32 %v2468_v41, %v1299_v46  ;;  %v1304_v50 = vsel %vm537_vm0, %v1302_v47, 0.0 }
 0x735   : > { %1305 = vadd.xlane.f32.xlu0 %v1304_v50 }
 0x736   : > { %v1303_v51 = vmul.f32 %v1301_v49, %v1301_v49 }
 0x738   : > { %v1307_v1 = vsel %vm537_vm0, %v1303_v51, 0.0 }
 0x739   : > { %1308 = vadd.xlane.f32.xlu0 %v1307_v1 }
 0x7be   : > { %v1306_v56 = vpop.xlane.xlu0 %1305 }
 0x7bf   : > { %v1310_v57 = vmul.f32 0.015625, %v1306_v56 }
 0x7c1   : > { %v1312_v58 = vadd.f32 1e-05, %v1310_v57 }
 0x7c2   : > { %v1309_v59 = vpop.xlane.xlu0 %1308 }
 0x7c3   : > { %1992 = vrsqrt.f32 %v1312_v58  ;;  %v1311_v60 = vmul.f32 0.015625, %v1309_v59 }
 0x7c5   : > { %v1313_v61 = vadd.f32 1e-05, %v1311_v60 }
 0x7c7   : > { %1994 = vrsqrt.f32 %v1313_v61 }
 0x7d0   : > { %v1993_v62 = vpop.eup %1992 }
 0x7d1   : > { %v1316_v63 = vmul.f32 %v1993_v62, %v1300_v45 }
 0x7d3   : > { %v1324_v5 = vmul.f32 %v1685_v2, %v1316_v63 }
 0x7d4   : > { %v1995_v3 = vpop.eup %1994 }
 0x7d5   : > { %v1317_v4 = vmul.f32 %v1995_v3, %v1301_v49  ;;  %v1332_v8 = vadd.f32 %v1686_v6, %v1324_v5 }
 0x7d7   : > { %v1325_v7 = vmul.f32 %v1685_v2, %v1317_v4 }
 0x7d9   : > { %v1333_v9 = vadd.f32 %v1686_v6, %v1325_v7 }
 0x7db   : > { %v1334_v10 = vpack.c.bf16 %v1333_v9, %v1332_v8 }
 0x7dd   : > { %1815 = vmatmul.mubr.msk.bf16.vlgmr.msra.gmra.mxu1 %vm537_vm0, %v1334_v10 }
 0x89d   : > { %v1411_v20 = vpop.f32.mrf.mxu1 }
 0x89e   : > { %v1412_v21 = vadd.f32 %v1687_v19, %v1411_v20 }
 0x89f   : > { %v1816_v22 = vpop.f32.mrf.mxu1 }
 0x8a0   : > { %v1693_v23 = vmul.f32 -1.702, %v1412_v21 }
 0x8a1   : > { %v1414_v24 = vpop.f32.mrf.mxu1 }
 0x8a2   : > { %v1422_v25 = vmul.f32 1.442695, %v1693_v23  ;;  %v1415_v26 = vadd.f32 %v1687_v19, %v1414_v24 }
 0x8a3   : > { %v1817_v27 = vpop.f32.mrf.mxu1 }
 0x8a4   : > { %1996 = vpow2.f32 %v1422_v25  ;;  %v1694_v48 = vmul.f32 -1.702, %v1415_v26 }
 0x8a6   : > { %v1424_v28 = vmul.f32 1.442695, %v1694_v48 }
 0x8a8   : > { %1998 = vpow2.f32 %v1424_v28 }
 0x8b1   : > { %v1997_v29 = vpop.eup %1996 }
 0x8b2   : > { %v1426_v30 = vadd.f32 1.0, %v1997_v29 }
 0x8b4   : > { %2000 = vrcp.f32 %v1426_v30 }
 0x8b5   : > { %v1999_v32 = vpop.eup %1998 }
 0x8b6   : > { %v1427_v31 = vadd.f32 1.0, %v1999_v32 }
 0x8b8   : > { %2002 = vrcp.f32 %v1427_v31 }
 0x8c1   : > { %v2001_v33 = vpop.eup %2000 }
 0x8c2   : > { %v1432_v35 = vmul.f32 %v2001_v33, %v1412_v21 }
 0x8c5   : > { %v2003_v34 = vpop.eup %2002 }
 0x8c6   : > { %v1433_v37 = vmul.f32 %v2003_v34, %v1415_v26 }
 0x8c8   : > { %v1434_v38 = vpack.c.bf16 %v1433_v37, %v1432_v35 }
 0x8ca   : > { %1835 = vmatmul.mubr.bf16.vlgmr.msra.gmra.mxu0 %v1434_v38 }
 0x98a   : > { %v1540_v40 = vpop.f32.mrf.mxu0 }
 0x98b   : > { %v1541_v42 = vadd.f32 %v1695_v39, %v1540_v40 }
 0x98c   : > { %v1836_v43 = vpop.f32.mrf.mxu0 }
 0x98d   : > { %v1547_v44 = vadd.f32 %v1541_v42, %v2463_v36 }
 0x98e   : > { %v1543_v45 = vpop.f32.mrf.mxu0 }
 0x98f   : > { %1549 = vst.msk [vmem:[%s517_s29] sm:$0xff] %vm537_vm0, %v1547_v44  ;;  %v1544_v0 = vadd.f32 %v1695_v39, %v1543_v45 }
 0x990   : > { %v1837_v46 = vpop.f32.mrf.mxu0 }
 0x991   : > { %v1548_v36 = vadd.f32 %v1544_v0, %v2468_v41 }
 0x993   : > { %1550 = vst.msk [vmem:[%s517_s29 + $0x8] sm:$0xff] %vm537_vm0, %v1548_v36 }
 0x994   : > { %2069 = shalt.err (!%p2066_p3)
}
 0x995   : > { %s2070_s28 = scalar_lea.hbm %s2530_s22, 256  ;;  %s2074_s23 = scalar_lea.hbm %s2591_s15, 512 }
 0x996   : > { %p2071_p2 = scmp.ne.s32.totalorder %s2530_s22, %s2070_s28  ;;  %p2075_p7 = scmp.lt.s32.totalorder %s2530_s22, %s2591_s15 }
 0x997   : > { %p2076_p6 = scmp.lt.s32.totalorder %s2074_s23, %s2070_s28 }
 0x998   : > { %p2072_p4 = pnand %p2071_p2, %p2262_p5 }
 0x999   : > { %p2077_p9 = por %p2076_p6, %p2075_p7 }
 0x99a   : > { %p2073_p13 = pneg %p2072_p4 }
 0x99c   : > { %p2078_p10 = pnand %p2077_p9, %p2073_p13 }
 0x99e   : > { %2081 = shalt.err (!%p2078_p10)
}
 0x99f   : > { %s2142_s25 = smov 128   ;;  %s2143_s16 = smov 8  }
 0x9a0   : > { %1846 = dma.vmem_to_hbm [thread:$0]  (%p2262_p5), %s2532_s17, 256, %s2530_s22, %s2536_s13, %s2142_s25, %s2142_s25, %s2143_s16  }
 0x9a1 PF: > { %p1863_p12 = scmp.ge.s32.totalorder %s2124_s21, 2  ;;  %s1580_s14 = sand.u32 1, %s2112_s18  }
 0x9a2   : > { %p2607_p8 = scmp.ne.s32.totalorder %s2600_s27, 0  ;;  %s1581_s28 = scalar_lea.sflag [#allocation4], %s1580_s14 }
 0x9a4   : > { %p1856_p11 = pnand %p1863_p12, %p2607_p8 }
 0x9a6   : > { %p1857_p0 = pneg %p1856_p11 }
 0x9a8   : > { %2107 = dma.done.wait (%p1857_p0), %s1581_s28, 256  }
 0x9a9   : > { %2109 = vsyncadd (%p1857_p0), %s1581_s28, 4294967040  ;;  %s2608_s21 = sld [smem:[#allocation12_spill]]  ;;  %s2611_s18 = smov %s2116_s19 }
 0x9aa   : > { %s2609_s24 = sld [smem:[#allocation11_spill]] }
 0x9ab   : > { %s2610_s20 = sld [smem:[#allocation13_spill]] }
 0x9af   : > { %p27_p1 = scmp.ge.s32.totalorder %s2608_s21, 4  }
 0x9b0   : > { %s2612_s19 = smov %s2609_s24 }
 0x9b1   :  { %29 = sbr.rel (!%p27_p1) target bundleno = 5 (0x5), region = 124 }
 0x9b6   :  { %1586 = vsyncpa [#allocation3], 1 }
 0x9b7   :  { %1588 = vsyncpa [#allocation3 + $0x1], 1 }
 0x9b8   :  { %1589 = vsyncpa [#allocation6], 1 }
 0x9b9   :  { %1590 = vsyncpa [#allocation4], 1 }
 0x9ba   :  { %1592 = vsyncpa [#allocation4 + $0x1], 1 }

</bundles_post_ra>
